<compile_context>
chip_gen: v5e
topology: v5e:2x2
jax: 0.10.0
libtpu: 0.0.40
codegen_flags: <defaults>
</compile_context>

<pallas_src>
import functools

import jax
import jax.numpy as jnp
from jax.experimental import pallas as pl
from jax.experimental.pallas import tpu as pltpu

_LANE = 128  # TPU lane width: feature dims padded to multiples of this


def _round_up(x, m):
    return ((x + m - 1) // m) * m


def _sublane_for(dtype):
    # Min sublane tile grows as dtype narrows: f32 -> 8, bf16 -> 16, int8/fp8 -> 32.
    return max(8, 32 // jnp.dtype(dtype).itemsize)


def _vmem_budget_bytes():
    """Generation-aware VMEM budget: ~85% of physical VMEM.

    v7x: ~54 MiB, v5e/v6e: ~108 MiB.  Falls back to a v7x-safe value if the
    hardware query is unavailable.
    """
    cap = None
    try:
        cap = getattr(pltpu.get_tpu_info(), "vmem_capacity_bytes", None)
    except Exception:
        cap = None
    if not cap:
        cap = 64 * 1024 * 1024
    return int(cap * 0.85)


def _pick_feature_tile(dim_p, target):
    """Largest multiple of 128 <= target that exactly divides dim_p (dim_p % 128 == 0)."""
    if dim_p <= target:
        return dim_p
    t = (target // _LANE) * _LANE
    while t > _LANE and dim_p % t != 0:
        t -= _LANE
    return t


# --------------------------------------------------------------------------
# Path A: fully fused MLP (all weights VMEM-resident, batch-tiled grid).
# --------------------------------------------------------------------------
def _fused_mlp_kernel(num_layers, x_ref, *refs):
    out_ref = refs[-1]
    wb = refs[:-1]                 # W0, b0, W1, b1, ...
    op_dtype = x_ref.dtype         # feed the MXU in the native dtype (bf16/f32)

    h = x_ref[...]
    for i in range(num_layers):
        w = wb[2 * i][...]                                   # native dtype
        b = wb[2 * i + 1][...]                                # (1, C_out) f32
        acc = jnp.dot(h, w, preferred_element_type=jnp.float32) + b
        if i < num_layers - 1:
            acc = jnp.maximum(acc, 0.0)                       # QReLU in f32 (VPU)
            # QDropout with p=0.0 / eval mode is the identity.
            h = acc.astype(op_dtype)                          # recast for next MXU feed
        else:
            out_ref[...] = acc.astype(out_ref.dtype)


# --------------------------------------------------------------------------
# Path B: per-layer K/N-tiled streaming matmul (for weights that exceed VMEM).
# --------------------------------------------------------------------------
def _streamed_linear_kernel(apply_relu, x_ref, w_ref, b_ref, o_ref, acc_ref):
    @pl.when(pl.program_id(2) == 0)
    def _():
        acc_ref[...] = jnp.zeros_like(acc_ref)

    acc_ref[...] += jnp.dot(x_ref[...], w_ref[...],
                            preferred_element_type=jnp.float32)

    @pl.when(pl.program_id(2) == pl.num_programs(2) - 1)
    def _():
        r = acc_ref[...] + b_ref[...]
        if apply_relu:
            r = jnp.maximum(r, 0.0)
        o_ref[...] = r.astype(o_ref.dtype)


def _streamed_linear(x_p, w_p, b_p, apply_relu, tm, budget):
    n_p, din_p = x_p.shape
    dout_p = w_p.shape[1]
    itemsize = jnp.dtype(x_p.dtype).itemsize
    tn = _pick_feature_tile(dout_p, 512)
    tk = _pick_feature_tile(din_p, 512)
    grid = (n_p // tm, dout_p // tn, din_p // tk)

    est = ((2 * tm * tk + 2 * tk * tn + 2 * tm * tn) * itemsize
           + 2 * tn * 4 + 2 * tm * tn * 4)
    vmem_limit = int(min(budget, max(32 * 1024 * 1024, est * 2)))

    return pl.pallas_call(
        functools.partial(_streamed_linear_kernel, apply_relu),
        out_shape=jax.ShapeDtypeStruct((n_p, dout_p), x_p.dtype),
        grid_spec=pltpu.PrefetchScalarGridSpec(
            num_scalar_prefetch=0,
            grid=grid,
            in_specs=[
                pl.BlockSpec((tm, tk), lambda i, j, k: (i, k)),
                pl.BlockSpec((tk, tn), lambda i, j, k: (k, j)),
                pl.BlockSpec((1, tn), lambda i, j, k: (0, j)),
            ],
            out_specs=pl.BlockSpec((tm, tn), lambda i, j, k: (i, j)),
            scratch_shapes=[pltpu.VMEM((tm, tn), jnp.float32)],
        ),
        compiler_params=pltpu.CompilerParams(
            dimension_semantics=("parallel", "parallel", "arbitrary"),
            vmem_limit_bytes=vmem_limit,
        ),
    )(x_p, w_p, b_p)


# --------------------------------------------------------------------------
# Wrapper
# --------------------------------------------------------------------------
def qmlp_forward(x, params, *, tile_m=512, dropout=0.0, batch_norm=False,
                 training=False, force_streaming=False):
    """x: [N, in_channels]; params: list of (W [Cin, Cout], b [Cout])."""
    if batch_norm:
        raise NotImplementedError("QBatchNorm1d path not implemented")  # TODO(synk): batch-norm stats
    if training and dropout > 0.0:
        # TODO(synk): training-mode dropout needs pltpu.prng_seed + prng_random_bits masking.
        raise NotImplementedError("training-mode QDropout (p>0) not implemented")
    # Eval-mode / p=0 dropout (including drop_input) is the identity.

    n, cin = x.shape
    num_layers = len(params)
    out_features = params[-1][0].shape[1]
    itemsize = jnp.dtype(x.dtype).itemsize
    sub = _sublane_for(x.dtype)
    budget = _vmem_budget_bytes()

    # Lane-dense padded feature dims (so every load/store is unmasked).
    cin_p = _round_up(cin, _LANE)
    dims_p = [_round_up(w.shape[1], _LANE) for w, _ in params]
    cout_p = dims_p[-1]

    # Dtype-aware batch tile; ensure >=2 grid steps when the batch allows it so
    # both v7x TensorCores get work under "parallel".
    n_align = _round_up(n, sub)
    tm = min(_round_up(tile_m, sub), n_align)
    grid_m = pl.cdiv(n_align, tm)
    if grid_m == 1 and n_align >= 2 * sub:
        tm = _round_up(pl.cdiv(n_align, 2), sub)
        grid_m = pl.cdiv(n_align, tm)
    n_p = grid_m * tm

    x_p = jnp.pad(x, ((0, n_p - n), (0, cin_p - cin)))

    # Zero-padded weights/biases: math stays exact, padded lanes sliced off at the end.
    # TODO(synk): true quantized weight path (int8 on v5e/v6e, fp8 on v7x) instead of astype(x.dtype).
    ws, bs = [], []
    prev = cin_p
    for (w, b), dout_p in zip(params, dims_p):
        din, dout = w.shape
        ws.append(jnp.pad(w.astype(x.dtype), ((0, prev - din), (0, dout_p - dout))))
        bs.append(jnp.pad(b.astype(jnp.float32), (0, dout_p - dout)).reshape(1, -1))
        prev = dout_p

    # Fused-path VMEM estimate: double-buffered x/out tiles, single-buffered
    # resident weights/biases, f32 acc + recast temp per layer (no double-count).
    est = 2 * tm * cin_p * itemsize + 2 * tm * cout_p * itemsize
    prev = cin_p
    for d in dims_p:
        est += prev * d * itemsize + d * 4      # Buffered(1) weights + bias, counted once
        est += 2 * tm * d * 4                   # f32 acc + cast temp
        prev = d

    use_streaming = force_streaming or est > int(0.7 * budget)

    if not use_streaming:
        vmem_limit = int(min(budget, max(32 * 1024 * 1024, est * 1.5)))
        flat_args = []
        in_specs = [pl.BlockSpec((tm, cin_p), lambda i: (i, 0))]
        for w_p, b_p in zip(ws, bs):
            flat_args.append(w_p)
            flat_args.append(b_p)
            # Constant index_map -> VMEM-resident across the batch grid; single
            # buffer since the block never changes.
            in_specs.append(pl.BlockSpec(w_p.shape, lambda i: (0, 0),
                                         pipeline_mode=pl.Buffered(1)))
            in_specs.append(pl.BlockSpec(b_p.shape, lambda i: (0, 0),
                                         pipeline_mode=pl.Buffered(1)))

        out_p = pl.pallas_call(
            functools.partial(_fused_mlp_kernel, num_layers),
            out_shape=jax.ShapeDtypeStruct((n_p, cout_p), x.dtype),
            grid_spec=pltpu.PrefetchScalarGridSpec(
                num_scalar_prefetch=0,
                grid=(grid_m,),
                in_specs=in_specs,
                # Lane-dense output store: cout_p is a multiple of 128.
                out_specs=pl.BlockSpec((tm, cout_p), lambda i: (i, 0)),
            ),
            compiler_params=pltpu.CompilerParams(
                dimension_semantics=("parallel",),   # batch axis shards across TCs
                vmem_limit_bytes=vmem_limit,
            ),
        )(x_p, *flat_args)
    else:
        # Weight-streaming path: one K/N-tiled matmul per layer with an f32
        # accumulator (fits v7x 64 MiB even for multi-thousand hidden dims).
        h = x_p
        for li, (w_p, b_p) in enumerate(zip(ws, bs)):
            h = _streamed_linear(h, w_p, b_p, li < num_layers - 1, tm, budget)
        out_p = h

    # Strip batch / feature padding outside the kernel.
    return out_p[:n, :out_features]


def init_qmlp_params(key, in_channels, hidden_channels, out_channels, num_layers):
    """Deterministic init mirroring torch.nn.Linear's uniform(-1/sqrt(fan_in), ...)."""
    dims = [in_channels] + [hidden_channels] * (num_layers - 1) + [out_channels]
    params = []
    for i in range(num_layers):
        fan_in, fan_out = dims[i], dims[i + 1]
        key, kw, kb = jax.random.split(key, 3)
        bound = 1.0 / jnp.sqrt(fan_in)
        w = jax.random.uniform(kw, (fan_in, fan_out), jnp.float32, -bound, bound)
        b = jax.random.uniform(kb, (fan_out,), jnp.float32, -bound, bound)
        params.append((w, b))
    return params


def qmlp_reference(x, params):
    """Pure-JAX reference for correctness checking."""
    h = x
    for i, (w, b) in enumerate(params):
        h = h @ w + b
        if i < len(params) - 1:
            h = jnp.maximum(h, 0.0)
    return h


if __name__ == "__main__":
    # Small shapes consistent with the module's forward.
    batch = 8
    in_channels = 16
    hidden_channels = 32
    out_channels = 16
    num_layers = 3  # Linear(16->32) + ReLU + Linear(32->32) + ReLU + Linear(32->16)

    key = jax.random.PRNGKey(0)
    key, kx = jax.random.split(key)
    x = jax.random.normal(kx, (batch, in_channels), jnp.float32)
    params = init_qmlp_params(key, in_channels, hidden_channels, out_channels, num_layers)
    ref = qmlp_reference(x, params)

    # Fused path (default for small resident weights).
    out = jax.block_until_ready(qmlp_forward(x, params))
    assert out.shape == (batch, out_channels)
    assert jnp.allclose(out, ref, atol=1e-5, rtol=1e-5), "fused path mismatch vs reference"

    # K/N-tiled weight-streaming path (auto-selected for large hidden dims on v7x).
    out_s = jax.block_until_ready(qmlp_forward(x, params, force_streaming=True))
    assert jnp.allclose(out_s, ref, atol=1e-5, rtol=1e-5), "streaming path mismatch vs reference"

    # bf16 input path (exercises dtype-aware 16-row sublane tiling + bf16 MXU feed).
    out_bf = jax.block_until_ready(qmlp_forward(x.astype(jnp.bfloat16), params))
    assert out_bf.shape == (batch, out_channels)
    assert jnp.allclose(out_bf.astype(jnp.float32), ref, atol=5e-2, rtol=5e-2), \
        "bf16 path mismatch vs reference"

    print("KERNEL_OK")
</pallas_src>

<mosaic_0001>
module attributes {stable_mosaic.version = 11 : i64} {
  func.func @_fused_mlp_kernel(%arg0: i32, %arg1: memref<8x128xf32, #tpu.memory_space<vmem>>, %arg2: memref<128x128xf32, #tpu.memory_space<vmem>>, %arg3: memref<1x128xf32, #tpu.memory_space<vmem>>, %arg4: memref<128x128xf32, #tpu.memory_space<vmem>>, %arg5: memref<1x128xf32, #tpu.memory_space<vmem>>, %arg6: memref<128x128xf32, #tpu.memory_space<vmem>>, %arg7: memref<1x128xf32, #tpu.memory_space<vmem>>, %arg8: memref<8x128xf32, #tpu.memory_space<vmem>>) attributes {dimension_semantics = [#tpu.dimension_semantics<parallel>], iteration_bounds = array<i64: 1>, scalar_prefetch = 0 : i64, scratch_operands = 0 : i64, tpu.core_type = #tpu.core_type<tc>, window_params = [{transform_indices = @transform_0, window_bounds = array<i64: 8, 128>}, {pipeline_mode = #tpu.pipeline_mode<synchronous>, transform_indices = @transform_1, window_bounds = array<i64: 128, 128>}, {pipeline_mode = #tpu.pipeline_mode<synchronous>, transform_indices = @transform_2, window_bounds = array<i64: 1, 128>}, {pipeline_mode = #tpu.pipeline_mode<synchronous>, transform_indices = @transform_3, window_bounds = array<i64: 128, 128>}, {pipeline_mode = #tpu.pipeline_mode<synchronous>, transform_indices = @transform_4, window_bounds = array<i64: 1, 128>}, {pipeline_mode = #tpu.pipeline_mode<synchronous>, transform_indices = @transform_5, window_bounds = array<i64: 128, 128>}, {pipeline_mode = #tpu.pipeline_mode<synchronous>, transform_indices = @transform_6, window_bounds = array<i64: 1, 128>}, {transform_indices = @transform_7, window_bounds = array<i64: 8, 128>}]} {
    %c0 = arith.constant 0 : index
    %c0_0 = arith.constant 0 : index
    %0 = vector.load %arg1[%c0, %c0_0] : memref<8x128xf32, #tpu.memory_space<vmem>>, vector<8x128xf32>
    %c0_1 = arith.constant 0 : index
    %c0_2 = arith.constant 0 : index
    %1 = vector.load %arg2[%c0_1, %c0_2] : memref<128x128xf32, #tpu.memory_space<vmem>>, vector<128x128xf32>
    %c0_3 = arith.constant 0 : index
    %c0_4 = arith.constant 0 : index
    %2 = vector.load %arg3[%c0_3, %c0_4] : memref<1x128xf32, #tpu.memory_space<vmem>>, vector<1x128xf32>
    %cst = arith.constant dense<0.000000e+00> : vector<8x128xf32>
    %3 = tpu.matmul %0, %1, %cst {dimension_numbers = #tpu.dot_dimension_numbers<[1], [0], [0], [1], [0, 0, 1, 1], [], []>} : vector<8x128xf32>, vector<128x128xf32>, vector<8x128xf32> -> vector<8x128xf32>
    %4 = vector.broadcast %2 : vector<1x128xf32> to vector<8x128xf32>
    %5 = arith.addf %3, %4 : vector<8x128xf32>
    %cst_5 = arith.constant 0.000000e+00 : f32
    %6 = vector.broadcast %cst_5 : f32 to vector<8x128xf32>
    %7 = arith.maximumf %5, %6 : vector<8x128xf32>
    %c0_6 = arith.constant 0 : index
    %c0_7 = arith.constant 0 : index
    %8 = vector.load %arg4[%c0_6, %c0_7] : memref<128x128xf32, #tpu.memory_space<vmem>>, vector<128x128xf32>
    %c0_8 = arith.constant 0 : index
    %c0_9 = arith.constant 0 : index
    %9 = vector.load %arg5[%c0_8, %c0_9] : memref<1x128xf32, #tpu.memory_space<vmem>>, vector<1x128xf32>
    %cst_10 = arith.constant dense<0.000000e+00> : vector<8x128xf32>
    %10 = tpu.matmul %7, %8, %cst_10 {dimension_numbers = #tpu.dot_dimension_numbers<[1], [0], [0], [1], [0, 0, 1, 1], [], []>} : vector<8x128xf32>, vector<128x128xf32>, vector<8x128xf32> -> vector<8x128xf32>
    %11 = vector.broadcast %9 : vector<1x128xf32> to vector<8x128xf32>
    %12 = arith.addf %10, %11 : vector<8x128xf32>
    %cst_11 = arith.constant 0.000000e+00 : f32
    %13 = vector.broadcast %cst_11 : f32 to vector<8x128xf32>
    %14 = arith.maximumf %12, %13 : vector<8x128xf32>
    %c0_12 = arith.constant 0 : index
    %c0_13 = arith.constant 0 : index
    %15 = vector.load %arg6[%c0_12, %c0_13] : memref<128x128xf32, #tpu.memory_space<vmem>>, vector<128x128xf32>
    %c0_14 = arith.constant 0 : index
    %c0_15 = arith.constant 0 : index
    %16 = vector.load %arg7[%c0_14, %c0_15] : memref<1x128xf32, #tpu.memory_space<vmem>>, vector<1x128xf32>
    %cst_16 = arith.constant dense<0.000000e+00> : vector<8x128xf32>
    %17 = tpu.matmul %14, %15, %cst_16 {dimension_numbers = #tpu.dot_dimension_numbers<[1], [0], [0], [1], [0, 0, 1, 1], [], []>} : vector<8x128xf32>, vector<128x128xf32>, vector<8x128xf32> -> vector<8x128xf32>
    %18 = vector.broadcast %16 : vector<1x128xf32> to vector<8x128xf32>
    %19 = arith.addf %17, %18 : vector<8x128xf32>
    %c0_17 = arith.constant 0 : index
    %c0_18 = arith.constant 0 : index
    %20 = vector.load %arg8[%c0_17, %c0_18] : memref<8x128xf32, #tpu.memory_space<vmem>>, vector<8x128xf32>
    tpu.vector_store %arg8[%c0_17, %c0_18], %19 {strides = array<i32>} : memref<8x128xf32, #tpu.memory_space<vmem>>, vector<8x128xf32>,
    return
  }
  func.func @transform_0(%arg0: i32) -> (i32, i32) {
    %c0_i32 = arith.constant 0 : i32
    %c0_i32_0 = arith.constant 0 : i32
    return %arg0, %c0_i32 : i32, i32
  }
  func.func @transform_1(%arg0: i32) -> (i32, i32) {
    %c0_i32 = arith.constant 0 : i32
    %c0_i32_0 = arith.constant 0 : i32
    %c0_i32_1 = arith.constant 0 : i32
    return %c0_i32, %c0_i32_0 : i32, i32
  }
  func.func @transform_2(%arg0: i32) -> (i32, i32) {
    %c0_i32 = arith.constant 0 : i32
    %c0_i32_0 = arith.constant 0 : i32
    %c0_i32_1 = arith.constant 0 : i32
    return %c0_i32, %c0_i32_0 : i32, i32
  }
  func.func @transform_3(%arg0: i32) -> (i32, i32) {
    %c0_i32 = arith.constant 0 : i32
    %c0_i32_0 = arith.constant 0 : i32
    %c0_i32_1 = arith.constant 0 : i32
    return %c0_i32, %c0_i32_0 : i32, i32
  }
  func.func @transform_4(%arg0: i32) -> (i32, i32) {
    %c0_i32 = arith.constant 0 : i32
    %c0_i32_0 = arith.constant 0 : i32
    %c0_i32_1 = arith.constant 0 : i32
    return %c0_i32, %c0_i32_0 : i32, i32
  }
  func.func @transform_5(%arg0: i32) -> (i32, i32) {
    %c0_i32 = arith.constant 0 : i32
    %c0_i32_0 = arith.constant 0 : i32
    %c0_i32_1 = arith.constant 0 : i32
    return %c0_i32, %c0_i32_0 : i32, i32
  }
  func.func @transform_6(%arg0: i32) -> (i32, i32) {
    %c0_i32 = arith.constant 0 : i32
    %c0_i32_0 = arith.constant 0 : i32
    %c0_i32_1 = arith.constant 0 : i32
    return %c0_i32, %c0_i32_0 : i32, i32
  }
  func.func @transform_7(%arg0: i32) -> (i32, i32) {
    %c0_i32 = arith.constant 0 : i32
    %c0_i32_0 = arith.constant 0 : i32
    return %arg0, %c0_i32 : i32, i32
  }
}

</mosaic_0001>

<bundles_post_ra>
// kernel: tpu_custom_call.1
= control target key start
LH: loop header
LB: loop body
LE: loop exit
PB: predicated region body
PF: predicated region fallthrough
CT: control target
= control target key end

     0   :  { %12 = vsyncpa [#allocation3], 0  ;;  %s440_s0 = inlined_call_operand.hbm [shape: f32[8,128], index: 0, kind: input, shape index: {}]   ;;  %s441_s1 = inlined_call_operand.hbm [shape: f32[128,128], index: 1, kind: input, shape index: {}]   ;;  %s442_s2 = inlined_call_operand.vmem [shape: f32[1,128], index: 2, kind: input, shape index: {}]   ;;  %s443_s3 = inlined_call_operand.hbm [shape: f32[128,128], index: 3, kind: input, shape index: {}]   ;;  %s444_s4 = inlined_call_operand.vmem [shape: f32[1,128], index: 4, kind: input, shape index: {}]   ;;  %s445_s5 = inlined_call_operand.hbm [shape: f32[128,128], index: 5, kind: input, shape index: {}]   ;;  %s446_s6 = inlined_call_operand.vmem [shape: f32[1,128], index: 6, kind: input, shape index: {}]   ;;  %s447_s7 = inlined_call_operand.hbm [shape: f32[8,128], index: 7, kind: output, shape index: {}]  }
   0x1   :  { %13 = vsyncpa [#allocation6], 0 }
   0x2   :  { %14 = vsyncpa [#allocation9], 0  ;;  %s31_s26 = sshll.u32 %s441_s1, 4  ;;  %s32_s26 = int_to_ptr.hbm [resolvable:$true] %s31_s26 }
   0x3   :  { %15 = vsyncpa [#allocation4], 0  ;;  %s369_s27 = smov [#allocation5]   ;;  %s21_s8 = sshll.u32 %s440_s0, 4  ;;  %s22_s8 = int_to_ptr.hbm [resolvable:$true] %s21_s8 }
   0x4   :  { %s33_s28 = sshll.u32 %s369_s27, 4  ;;  %s370_s9 = smov 128   ;;  %s34_s28 = int_to_ptr.vmem [resolvable:$true] %s33_s28 }
   0x5   :  { %s371_s10 = smov 8   ;;  %s372_s11 = smov [#allocation2]  }
   0x6   :  { %39 = dma.hbm_to_vmem [thread:$0]  %s32_s26, 2048, %s34_s28, [#allocation6], %s370_s9, %s370_s9, %s371_s10  }
   0x7   :  { %s23_s12 = sshll.u32 %s372_s11, 4  ;;  %s46_s15 = sshll.u32 %s443_s3, 4  ;;  %s24_s12 = int_to_ptr.vmem [resolvable:$true] %s23_s12  ;;  %s47_s15 = int_to_ptr.hbm [resolvable:$true] %s46_s15 }
   0x8   :  { %26 = dma.hbm_to_vmem [thread:$0]  %s22_s8, 128, %s24_s12, [#allocation3]  }
   0x9   :  { %s61_s17 = sshll.u32 %s445_s5, 4  ;;  %s373_s18 = smov [#allocation7]   ;;  %s62_s17 = int_to_ptr.hbm [resolvable:$true] %s61_s17 }
   0xa   :  { %s48_s19 = sshll.u32 %s373_s18, 4  ;;  %s374_s0 = smov [#allocation8]   ;;  %s49_s19 = int_to_ptr.vmem [resolvable:$true] %s48_s19 }
   0xb   :  { %54 = dma.hbm_to_vmem [thread:$0]  %s47_s15, 2048, %s49_s19, [#allocation6], %s370_s9, %s370_s9, %s371_s10  }
   0xc   :  { %s63_s20 = sshll.u32 %s374_s0, 4  ;;  %s64_s20 = int_to_ptr.vmem [resolvable:$true] %s63_s20 }
   0xd   :  { %69 = dma.hbm_to_vmem [thread:$0]  %s62_s17, 2048, %s64_s20, [#allocation9], %s370_s9, %s370_s9, %s371_s10  }
   0xe   :  { %361 = dma.done.wait [#allocation3], 128  }
   0xf   :  { %362 = vsyncadd [#allocation3], 4294967168 }
  0x10   :  { %363 = dma.done.wait [#allocation6], 4096  }
  0x11   :  { %364 = vsyncadd [#allocation6], 4294963200 }
  0x12   :  { %365 = dma.done.wait [#allocation9], 2048  }
  0x13   :  { %366 = vsyncadd [#allocation9], 4294965248  ;;  %v104_v0 = vld [vmem:[#allocation5 + $0x78] sm:$0xff]  ;;  %v103_v1 = vld [vmem:[#allocation5 + $0x70] sm:$0xff]  ;;  %s375_s24 = smov [#allocation10]   ;;  %s219_s28 = sshll.u32 %s447_s7, 4  ;;  %s220_s28 = int_to_ptr.hbm [resolvable:$true] %s219_s28 }
  0x14   :  { %109 = vmatpush.msra.mxu0 %v104_v0  ;;  %v102_v2 = vld [vmem:[#allocation5 + $0x68] sm:$0xff]  ;;  %v101_v3 = vld [vmem:[#allocation5 + $0x60] sm:$0xff]  ;;  %v145_v4 = vld [vmem:[#allocation7 + $0x78] sm:$0xff]  ;;  %s217_s25 = sshll.u32 %s375_s24, 4  ;;  %s218_s25 = int_to_ptr.vmem [resolvable:$true] %s217_s25 }
  0x15   :  { %v100_v5 = vld [vmem:[#allocation5 + $0x58] sm:$0xff]  ;;  %150 = vmatpush.msra.mxu1 %v145_v4  ;;  %v144_v6 = vld [vmem:[#allocation7 + $0x70] sm:$0xff]  ;;  %v143_v7 = vld [vmem:[#allocation7 + $0x68] sm:$0xff] }
  0x16   :  { %110 = vmatpush.msra.mxu0 %v103_v1  ;;  %v99_v8 = vld [vmem:[#allocation5 + $0x50] sm:$0xff]  ;;  %v142_v9 = vld [vmem:[#allocation7 + $0x60] sm:$0xff]  ;;  %v98_v10 = vld [vmem:[#allocation5 + $0x48] sm:$0xff] }
  0x17   :  { %151 = vmatpush.msra.mxu1 %v144_v6  ;;  %v141_v11 = vld [vmem:[#allocation7 + $0x58] sm:$0xff]  ;;  %v97_v12 = vld [vmem:[#allocation5 + $0x40] sm:$0xff]  ;;  %v140_v13 = vld [vmem:[#allocation7 + $0x50] sm:$0xff] }
  0x18   :  { %111 = vmatpush.msra.mxu0 %v102_v2  ;;  %v96_v14 = vld [vmem:[#allocation5 + $0x38] sm:$0xff]  ;;  %v139_v15 = vld [vmem:[#allocation7 + $0x48] sm:$0xff]  ;;  %v95_v16 = vld [vmem:[#allocation5 + $0x30] sm:$0xff] }
  0x19   :  { %152 = vmatpush.msra.mxu1 %v143_v7  ;;  %v138_v17 = vld [vmem:[#allocation7 + $0x40] sm:$0xff]  ;;  %v94_v18 = vld [vmem:[#allocation5 + $0x28] sm:$0xff]  ;;  %v137_v19 = vld [vmem:[#allocation7 + $0x38] sm:$0xff] }
  0x1a   :  { %112 = vmatpush.msra.mxu0 %v101_v3  ;;  %v93_v20 = vld [vmem:[#allocation5 + $0x20] sm:$0xff]  ;;  %v136_v21 = vld [vmem:[#allocation7 + $0x30] sm:$0xff]  ;;  %v92_v22 = vld [vmem:[#allocation5 + $0x18] sm:$0xff] }
  0x1b   :  { %153 = vmatpush.msra.mxu1 %v142_v9  ;;  %v135_v23 = vld [vmem:[#allocation7 + $0x28] sm:$0xff]  ;;  %v91_v24 = vld [vmem:[#allocation5 + $0x10] sm:$0xff]  ;;  %v134_v25 = vld [vmem:[#allocation7 + $0x20] sm:$0xff] }
  0x1c   :  { %113 = vmatpush.msra.mxu0 %v100_v5  ;;  %v90_v26 = vld [vmem:[#allocation5 + $0x8] sm:$0xff]  ;;  %v133_v27 = vld [vmem:[#allocation7 + $0x18] sm:$0xff]  ;;  %v89_v28 = vld [vmem:[#allocation5] sm:$0xff] }
  0x1d   :  { %154 = vmatpush.msra.mxu1 %v141_v11  ;;  %v88_v29 = vld [vmem:[#allocation2] sm:$0xff]  ;;  %v132_v30 = vld [vmem:[#allocation7 + $0x10] sm:$0xff]  ;;  %v131_v31 = vld [vmem:[#allocation7 + $0x8] sm:$0xff] }
  0x1e   :  { %114 = vmatpush.msra.mxu0 %v99_v8  ;;  %v130_v32 = vld [vmem:[#allocation7] sm:$0xff]  ;;  %v186_v33 = vld [vmem:[#allocation8 + $0x78] sm:$0xff]  ;;  %v185_v34 = vld [vmem:[#allocation8 + $0x70] sm:$0xff] }
  0x1f   :  { %155 = vmatpush.msra.mxu1 %v140_v13  ;;  %191 = vmatpush.msra.mxu2 %v186_v33  ;;  %v184_v35 = vld [vmem:[#allocation8 + $0x68] sm:$0xff]  ;;  %v183_v36 = vld [vmem:[#allocation8 + $0x60] sm:$0xff]  ;;  %v182_v37 = vld [vmem:[#allocation8 + $0x58] sm:$0xff] }
  0x20   :  { %115 = vmatpush.msra.mxu0 %v98_v10  ;;  %v181_v38 = vld [vmem:[#allocation8 + $0x50] sm:$0xff]  ;;  %v180_v39 = vld [vmem:[#allocation8 + $0x48] sm:$0xff]  ;;  %v179_v40 = vld [vmem:[#allocation8 + $0x40] sm:$0xff] }
  0x21   :  { %156 = vmatpush.msra.mxu1 %v139_v15  ;;  %192 = vmatpush.msra.mxu2 %v185_v34  ;;  %v178_v41 = vld [vmem:[#allocation8 + $0x38] sm:$0xff]  ;;  %v177_v42 = vld [vmem:[#allocation8 + $0x30] sm:$0xff]  ;;  %v176_v43 = vld [vmem:[#allocation8 + $0x28] sm:$0xff] }
  0x22   :  { %116 = vmatpush.msra.mxu0 %v97_v12  ;;  %v175_v44 = vld [vmem:[#allocation8 + $0x20] sm:$0xff]  ;;  %v174_v45 = vld [vmem:[#allocation8 + $0x18] sm:$0xff]  ;;  %v173_v50 = vld [vmem:[#allocation8 + $0x10] sm:$0xff] }
  0x23   :  { %157 = vmatpush.msra.mxu1 %v138_v17  ;;  %193 = vmatpush.msra.mxu2 %v184_v35  ;;  %v238_v46 = vld [vmem:[%s442_s2] ss:$0 sm:$0xff]  ;;  %v172_v51 = vld [vmem:[#allocation8 + $0x8] sm:$0xff]  ;;  %v171_v52 = vld [vmem:[#allocation8] sm:$0xff] }
  0x24   :  { %117 = vmatpush.msra.mxu0 %v96_v14  ;;  %v239_v53 = vld [vmem:[%s444_s4] ss:$0 sm:$0xff] }
  0x25   :  { %158 = vmatpush.msra.mxu1 %v137_v19  ;;  %194 = vmatpush.msra.mxu2 %v183_v36  ;;  %v240_v57 = vld [vmem:[%s446_s6] ss:$0 sm:$0xff] }
  0x26   :  { %118 = vmatpush.msra.mxu0 %v95_v16 }
  0x27   :  { %159 = vmatpush.msra.mxu1 %v136_v21  ;;  %195 = vmatpush.msra.mxu2 %v182_v37 }
  0x28   :  { %119 = vmatpush.msra.mxu0 %v94_v18 }
  0x29   :  { %160 = vmatpush.msra.mxu1 %v135_v23  ;;  %196 = vmatpush.msra.mxu2 %v181_v38 }
  0x2a   :  { %120 = vmatpush.msra.mxu0 %v93_v20 }
  0x2b   :  { %161 = vmatpush.msra.mxu1 %v134_v25  ;;  %197 = vmatpush.msra.mxu2 %v180_v39 }
  0x2c   :  { %121 = vmatpush.msra.mxu0 %v92_v22 }
  0x2d   :  { %162 = vmatpush.msra.mxu1 %v133_v27  ;;  %198 = vmatpush.msra.mxu2 %v179_v40 }
  0x2e   :  { %122 = vmatpush.msra.mxu0 %v91_v24 }
  0x2f   :  { %163 = vmatpush.msra.mxu1 %v132_v30  ;;  %199 = vmatpush.msra.mxu2 %v178_v41 }
  0x30   :  { %123 = vmatpush.msra.mxu0 %v90_v26 }
  0x31   :  { %164 = vmatpush.msra.mxu1 %v131_v31  ;;  %200 = vmatpush.msra.mxu2 %v177_v42 }
  0x32   :  { %124 = vmatpush.msra.mxu0 %v89_v28 }
  0x33   :  { %125 = vmatmul.f32.vlgmr.msra.gmra.mxu0 %v88_v29  ;;  %165 = vmatpush.msra.mxu1 %v130_v32 }
  0x34   :  { %201 = vmatpush.msra.mxu2 %v176_v43 }
  0x36   :  { %202 = vmatpush.msra.mxu2 %v175_v44 }
  0x38   :  { %203 = vmatpush.msra.mxu2 %v174_v45 }
  0x3a   :  { %204 = vmatpush.msra.mxu2 %v173_v50 }
  0x3c   :  { %205 = vmatpush.msra.mxu2 %v172_v51 }
  0x3e   :  { %206 = vmatpush.msra.mxu2 %v171_v52 }
  0xb0   :  { %v126_v47 = vpop.f32.mrf.mxu0 }
  0xb1   :  { %v127_v48 = vadd.f32 %v238_v46, %v126_v47 }
  0xb3   :  { %v129_v49 = vmax.f32 %v127_v48, 0.0 }
  0xb5   :  { %166 = vmatmul.f32.vlgmr.msra.gmra.mxu1 %v129_v49 }
 0x132   :  { %v167_v54 = vpop.f32.mrf.mxu1 }
 0x133   :  { %v168_v55 = vadd.f32 %v239_v53, %v167_v54 }
 0x135   :  { %v170_v56 = vmax.f32 %v168_v55, 0.0 }
 0x137   :  { %207 = vmatmul.f32.vlgmr.msra.gmra.mxu2 %v170_v56 }
 0x1ba   :  { %v208_v58 = vpop.f32.mrf.mxu2 }
 0x1bb   :  { %v209_v59 = vadd.f32 %v240_v57, %v208_v58 }
 0x1bd   :  { %211 = vst [vmem:[#allocation10] sm:$0xff] %v209_v59 }
 0x1be   :  { %222 = dma.vmem_to_hbm [thread:$0]  %s218_s25, 128, %s220_s28, [#allocation4]  }
 0x1bf   :  { %367 = dma.done.wait [#allocation4], 128  }
 0x1c0   :  { %368 = vsyncadd [#allocation4], 4294967168 }
 0x1c1   :  { %227 = vsyncpa [#allocation3], 1 }
 0x1c2   :  { %228 = vsyncpa [#allocation6], 1 }
 0x1c3   :  { %229 = vsyncpa [#allocation9], 1 }
 0x1c4   :  { %230 = vsyncpa [#allocation4], 1 }

</bundles_post_ra>
